<compile_context>
chip_gen: v5e
topology: v5e:2x2
jax: 0.10.0
libtpu: 0.0.40
codegen_flags: <defaults>
</compile_context>

<pallas_src>
import jax
import jax.numpy as jnp
from jax.experimental import pallas as pl
from jax.experimental.pallas import tpu as pltpu

# ---------------- model hyper-parameters (synthetic, deterministic) ----------------
B, C, H, W = 2, 4, 16, 16          # input image batch (NCHW)
IN_DIM = C * H * W                 # 1024
HIDDEN = 32
Z_DIM = 8
ZP = 128                           # latent dim zero-padded to a full lane width
LAT_BND = 3.0                      # lat_bnd of LatActSoftsign
GAUSS_SIGMA = 0.1                  # only used in training mode
# TODO(synk): training-mode gaussian noise injection (torch.randn_like) is omitted;
# this kernel implements the deterministic eval-mode forward (self.training == False).

# packed-bias layout (all offsets are multiples of 128 lanes)
B1_OFF, B2_OFF, B3_OFF, B4_OFF = 0, 128, 256, 384
BIAS_W = B4_OFF + IN_DIM           # 1408


def _round_up(n, m):
    return (n + m - 1) // m * m


def _cdiv(a, b):
    return (a + b - 1) // b


def _gcae_kernel(x_ref, w1_ref, w2_ref, w3_ref, w4_ref, bias_ref,
                 xhat_ref, zphi_ref):
    """Fused GCAE forward for one batch tile: enc MLP -> scaled softsign -> dec MLP."""
    x = x_ref[...]                                                   # (TB, IN_DIM) bf16

    # packed biases (f32), static 128-aligned lane slices
    b1 = bias_ref[:, B1_OFF:B1_OFF + HIDDEN]
    b2 = bias_ref[:, B2_OFF:B2_OFF + ZP]
    b3 = bias_ref[:, B3_OFF:B3_OFF + HIDDEN]
    b4 = bias_ref[:, B4_OFF:B4_OFF + IN_DIM]

    # ---- encoder: Linear(IN_DIM -> HIDDEN) + ReLU + Linear(HIDDEN -> ZP) ----
    h1 = jnp.dot(x, w1_ref[...], preferred_element_type=jnp.float32) + b1
    h1 = jnp.maximum(h1, 0.0)
    # w2/b2 are zero-padded from Z_DIM -> ZP columns, so z_pre is lane-dense (TB, 128)
    z_pre = jnp.dot(h1.astype(jnp.bfloat16), w2_ref[...],
                    preferred_element_type=jnp.float32) + b2

    # ---- LatActSoftsign: scl * softsign(z/scl) = z / (1 + |z| / scl) ----
    z_phi = z_pre / (1.0 + jnp.abs(z_pre) * (1.0 / LAT_BND))
    z_phi_bf = z_phi.astype(jnp.bfloat16)
    zphi_ref[...] = z_phi_bf                                         # unmasked 128-lane store

    # eval mode: z_psi = z = z_phi (no gaussian noise)
    z_psi = z_phi_bf

    # ---- decoder: Linear(ZP -> HIDDEN) + ReLU + Linear(HIDDEN -> IN_DIM) ----
    # w3 is zero-padded from Z_DIM -> ZP rows; padded latent lanes are exactly 0.
    h2 = jnp.dot(z_psi, w3_ref[...], preferred_element_type=jnp.float32) + b3
    h2 = jnp.maximum(h2, 0.0)
    x_hat = jnp.dot(h2.astype(jnp.bfloat16), w4_ref[...],
                    preferred_element_type=jnp.float32) + b4
    xhat_ref[...] = x_hat.astype(jnp.bfloat16)                       # bf16 writeback


def prepare_params(params):
    """bf16-cast all weights, zero-pad the latent dim to ZP lanes, pack biases (done once)."""
    w1, b1, w2, b2, w3, b3, w4, b4 = params
    w1b = w1.astype(jnp.bfloat16)
    w2p = (jnp.zeros((HIDDEN, ZP), jnp.float32).at[:, :Z_DIM].set(w2)
           ).astype(jnp.bfloat16)
    w3p = (jnp.zeros((ZP, HIDDEN), jnp.float32).at[:Z_DIM, :].set(w3)
           ).astype(jnp.bfloat16)
    w4b = w4.astype(jnp.bfloat16)
    bias = jnp.zeros((1, BIAS_W), jnp.float32)
    bias = bias.at[:, B1_OFF:B1_OFF + HIDDEN].set(b1)
    bias = bias.at[:, B2_OFF:B2_OFF + Z_DIM].set(b2)
    bias = bias.at[:, B3_OFF:B3_OFF + HIDDEN].set(b3)
    bias = bias.at[:, B4_OFF:B4_OFF + IN_DIM].set(b4)
    return (w1b, w2p, w3p, w4b, bias)


def gcae_forward(x_nchw, prepared_params):
    """Run the fused GCAE forward.

    Returns (x_hat NCHW bf16, z_phi (B, Z_DIM) f32)."""
    b = x_nchw.shape[0]
    x_flat = x_nchw.reshape(b, -1).astype(jnp.bfloat16)   # row-major == torch flatten

    # Only align batch to the 8-row sublane boundary (<= 7 pad rows); ragged
    # last tiles are handled by Pallas edge masking, so no full-tile pad copy.
    b_pad = _round_up(max(b, 8), 8)
    if b_pad >= 16:
        # at least 2 grid steps so v7x's 2 TensorCores both get work; 512-row cap
        tile_b = min(512, _round_up(_cdiv(b_pad, 2), 8))
    else:
        tile_b = b_pad
    if b_pad != b:
        x_flat = jnp.pad(x_flat, ((0, b_pad - b), (0, 0)))
    n_tiles = _cdiv(b_pad, tile_b)

    w1, w2p, w3p, w4b, bias = prepared_params

    const2d = lambda shape: pl.BlockSpec(shape, lambda i: (0, 0))  # weights: resident in VMEM

    grid_spec = pltpu.PrefetchScalarGridSpec(
        num_scalar_prefetch=0,
        grid=(n_tiles,),
        in_specs=[
            pl.BlockSpec((tile_b, IN_DIM), lambda i: (i, 0)),   # x tile (bf16)
            const2d((IN_DIM, HIDDEN)),                          # w1 (bf16)
            const2d((HIDDEN, ZP)),                              # w2 (bf16, padded)
            const2d((ZP, HIDDEN)),                              # w3 (bf16, padded)
            const2d((HIDDEN, IN_DIM)),                          # w4 (bf16)
            const2d((1, BIAS_W)),                               # packed biases (f32)
        ],
        out_specs=[
            pl.BlockSpec((tile_b, IN_DIM), lambda i: (i, 0)),   # x_hat (bf16)
            pl.BlockSpec((tile_b, ZP), lambda i: (i, 0)),       # z_phi (bf16, lane-dense)
        ],
    )

    xhat_pad, zphi_pad = pl.pallas_call(
        _gcae_kernel,
        out_shape=(jax.ShapeDtypeStruct((b_pad, IN_DIM), jnp.bfloat16),
                   jax.ShapeDtypeStruct((b_pad, ZP), jnp.bfloat16)),
        grid_spec=grid_spec,
        compiler_params=pltpu.CompilerParams(
            dimension_semantics=("parallel",)),   # v7x: shard batch tiles across TCs
    )(x_flat, w1, w2p, w3p, w4b, bias)

    x_hat = xhat_pad[:b].reshape(x_nchw.shape)            # bf16 reconstruction
    z_phi = zphi_pad[:b, :Z_DIM].astype(jnp.float32)      # tiny slice + cast
    return x_hat, z_phi


def init_params(key):
    """Deterministic small-init of enc/dec MLP parameters (f32, unpadded 'module' params)."""
    k1, k2, k3, k4 = jax.random.split(key, 4)
    scale = 0.05
    w1 = scale * jax.random.normal(k1, (IN_DIM, HIDDEN), jnp.float32)
    b1 = jnp.zeros((1, HIDDEN), jnp.float32)
    w2 = scale * jax.random.normal(k2, (HIDDEN, Z_DIM), jnp.float32)
    b2 = jnp.zeros((1, Z_DIM), jnp.float32)
    w3 = scale * jax.random.normal(k3, (Z_DIM, HIDDEN), jnp.float32)
    b3 = jnp.zeros((1, HIDDEN), jnp.float32)
    w4 = scale * jax.random.normal(k4, (HIDDEN, IN_DIM), jnp.float32)
    b4 = jnp.zeros((1, IN_DIM), jnp.float32)
    return (w1, b1, w2, b2, w3, b3, w4, b4)


def gcae_reference(x_nchw, params):
    """Pure-JAX f32 reference of the same forward (module semantics), for checking."""
    w1, b1, w2, b2, w3, b3, w4, b4 = params
    x = x_nchw.reshape(x_nchw.shape[0], -1).astype(jnp.float32)
    h1 = jnp.maximum(x @ w1 + b1, 0.0)
    z_pre = h1 @ w2 + b2
    z_phi = LAT_BND * (z_pre / LAT_BND) / (1.0 + jnp.abs(z_pre / LAT_BND))  # scl*softsign(x/scl)
    h2 = jnp.maximum(z_phi @ w3 + b3, 0.0)
    x_hat = h2 @ w4 + b4
    return x_hat.reshape(x_nchw.shape), z_phi


if __name__ == "__main__":
    key = jax.random.PRNGKey(0)
    kx, kp = jax.random.split(key)
    x = jax.random.normal(kx, (B, C, H, W), jnp.float32)   # NCHW, like PyTorch
    params = init_params(kp)
    prepped = prepare_params(params)

    x_hat, z_phi = gcae_forward(x, prepped)
    jax.block_until_ready((x_hat, z_phi))

    # sanity check against pure-f32 reference (tolerances loosened for bf16 weights/outputs)
    x_hat_ref, z_phi_ref = gcae_reference(x, params)
    assert x_hat.shape == (B, C, H, W)
    assert z_phi.shape == (B, Z_DIM)
    assert jnp.allclose(x_hat.astype(jnp.float32), x_hat_ref, atol=1e-2, rtol=5e-2)
    assert jnp.allclose(z_phi, z_phi_ref, atol=1e-2, rtol=5e-2)

    print("KERNEL_OK")
</pallas_src>

<mosaic_0001>
module attributes {stable_mosaic.version = 11 : i64} {
  func.func @_gcae_kernel(%arg0: i32, %arg1: memref<8x1024xbf16, #tpu.memory_space<vmem>>, %arg2: memref<1024x32xbf16, #tpu.memory_space<vmem>>, %arg3: memref<32x128xbf16, #tpu.memory_space<vmem>>, %arg4: memref<128x32xbf16, #tpu.memory_space<vmem>>, %arg5: memref<32x1024xbf16, #tpu.memory_space<vmem>>, %arg6: memref<1x1408xf32, #tpu.memory_space<vmem>>, %arg7: memref<8x1024xbf16, #tpu.memory_space<vmem>>, %arg8: memref<8x128xbf16, #tpu.memory_space<vmem>>) attributes {dimension_semantics = [#tpu.dimension_semantics<parallel>], iteration_bounds = array<i64: 1>, scalar_prefetch = 0 : i64, scratch_operands = 0 : i64, tpu.core_type = #tpu.core_type<tc>, window_params = [{transform_indices = @transform_0, window_bounds = array<i64: 8, 1024>}, {pipeline_mode = #tpu.pipeline_mode<synchronous>, transform_indices = @transform_1, window_bounds = array<i64: 1024, 32>}, {pipeline_mode = #tpu.pipeline_mode<synchronous>, transform_indices = @transform_2, window_bounds = array<i64: 32, 128>}, {pipeline_mode = #tpu.pipeline_mode<synchronous>, transform_indices = @transform_3, window_bounds = array<i64: 128, 32>}, {pipeline_mode = #tpu.pipeline_mode<synchronous>, transform_indices = @transform_4, window_bounds = array<i64: 32, 1024>}, {pipeline_mode = #tpu.pipeline_mode<synchronous>, transform_indices = @transform_5, window_bounds = array<i64: 1, 1408>}, {transform_indices = @transform_6, window_bounds = array<i64: 8, 1024>}, {transform_indices = @transform_7, window_bounds = array<i64: 8, 128>}]} {
    %c0 = arith.constant 0 : index
    %c0_0 = arith.constant 0 : index
    %0 = vector.load %arg1[%c0, %c0_0] : memref<8x1024xbf16, #tpu.memory_space<vmem>>, vector<8x1024xbf16>
    %c0_1 = arith.constant 0 : index
    %c0_2 = arith.constant 0 : index
    %1 = vector.load %arg6[%c0_1, %c0_2] : memref<1x1408xf32, #tpu.memory_space<vmem>>, vector<1x32xf32>
    %c0_3 = arith.constant 0 : index
    %c128 = arith.constant 128 : index
    %2 = vector.load %arg6[%c0_3, %c128] : memref<1x1408xf32, #tpu.memory_space<vmem>>, vector<1x128xf32>
    %c0_4 = arith.constant 0 : index
    %c256 = arith.constant 256 : index
    %3 = vector.load %arg6[%c0_4, %c256] : memref<1x1408xf32, #tpu.memory_space<vmem>>, vector<1x32xf32>
    %c0_5 = arith.constant 0 : index
    %c384 = arith.constant 384 : index
    %4 = vector.load %arg6[%c0_5, %c384] : memref<1x1408xf32, #tpu.memory_space<vmem>>, vector<1x1024xf32>
    %c0_6 = arith.constant 0 : index
    %c0_7 = arith.constant 0 : index
    %5 = vector.load %arg2[%c0_6, %c0_7] : memref<1024x32xbf16, #tpu.memory_space<vmem>>, vector<1024x32xbf16>
    %cst = arith.constant dense<0.000000e+00> : vector<8x32xf32>
    %6 = tpu.matmul %0, %5, %cst {dimension_numbers = #tpu.dot_dimension_numbers<[1], [0], [0], [1], [0, 0, 1, 1], [], []>} : vector<8x1024xbf16>, vector<1024x32xbf16>, vector<8x32xf32> -> vector<8x32xf32>
    %7 = vector.broadcast %1 : vector<1x32xf32> to vector<8x32xf32>
    %8 = arith.addf %6, %7 : vector<8x32xf32>
    %cst_8 = arith.constant 0.000000e+00 : f32
    %9 = vector.broadcast %cst_8 : f32 to vector<8x32xf32>
    %10 = arith.maximumf %8, %9 : vector<8x32xf32>
    %11 = arith.truncf %10 : vector<8x32xf32> to vector<8x32xbf16>
    %c0_9 = arith.constant 0 : index
    %c0_10 = arith.constant 0 : index
    %12 = vector.load %arg3[%c0_9, %c0_10] : memref<32x128xbf16, #tpu.memory_space<vmem>>, vector<32x128xbf16>
    %cst_11 = arith.constant dense<0.000000e+00> : vector<8x128xf32>
    %13 = tpu.matmul %11, %12, %cst_11 {dimension_numbers = #tpu.dot_dimension_numbers<[1], [0], [0], [1], [0, 0, 1, 1], [], []>} : vector<8x32xbf16>, vector<32x128xbf16>, vector<8x128xf32> -> vector<8x128xf32>
    %14 = vector.broadcast %2 : vector<1x128xf32> to vector<8x128xf32>
    %15 = arith.addf %13, %14 : vector<8x128xf32>
    %16 = math.absf %15 : vector<8x128xf32>
    %cst_12 = arith.constant 0.333333343 : f32
    %17 = vector.broadcast %cst_12 : f32 to vector<8x128xf32>
    %18 = arith.mulf %16, %17 : vector<8x128xf32>
    %cst_13 = arith.constant 1.000000e+00 : f32
    %19 = vector.broadcast %cst_13 : f32 to vector<8x128xf32>
    %20 = arith.addf %19, %18 : vector<8x128xf32>
    %21 = arith.divf %15, %20 : vector<8x128xf32>
    %22 = arith.truncf %21 : vector<8x128xf32> to vector<8x128xbf16>
    %c0_14 = arith.constant 0 : index
    %c0_15 = arith.constant 0 : index
    %23 = vector.load %arg8[%c0_14, %c0_15] : memref<8x128xbf16, #tpu.memory_space<vmem>>, vector<8x128xbf16>
    tpu.vector_store %arg8[%c0_14, %c0_15], %22 {strides = array<i32>} : memref<8x128xbf16, #tpu.memory_space<vmem>>, vector<8x128xbf16>,
    %c0_16 = arith.constant 0 : index
    %c0_17 = arith.constant 0 : index
    %24 = vector.load %arg4[%c0_16, %c0_17] : memref<128x32xbf16, #tpu.memory_space<vmem>>, vector<128x32xbf16>
    %cst_18 = arith.constant dense<0.000000e+00> : vector<8x32xf32>
    %25 = tpu.matmul %22, %24, %cst_18 {dimension_numbers = #tpu.dot_dimension_numbers<[1], [0], [0], [1], [0, 0, 1, 1], [], []>} : vector<8x128xbf16>, vector<128x32xbf16>, vector<8x32xf32> -> vector<8x32xf32>
    %26 = vector.broadcast %3 : vector<1x32xf32> to vector<8x32xf32>
    %27 = arith.addf %25, %26 : vector<8x32xf32>
    %cst_19 = arith.constant 0.000000e+00 : f32
    %28 = vector.broadcast %cst_19 : f32 to vector<8x32xf32>
    %29 = arith.maximumf %27, %28 : vector<8x32xf32>
    %30 = arith.truncf %29 : vector<8x32xf32> to vector<8x32xbf16>
    %c0_20 = arith.constant 0 : index
    %c0_21 = arith.constant 0 : index
    %31 = vector.load %arg5[%c0_20, %c0_21] : memref<32x1024xbf16, #tpu.memory_space<vmem>>, vector<32x1024xbf16>
    %cst_22 = arith.constant dense<0.000000e+00> : vector<8x1024xf32>
    %32 = tpu.matmul %30, %31, %cst_22 {dimension_numbers = #tpu.dot_dimension_numbers<[1], [0], [0], [1], [0, 0, 1, 1], [], []>} : vector<8x32xbf16>, vector<32x1024xbf16>, vector<8x1024xf32> -> vector<8x1024xf32>
    %33 = vector.broadcast %4 : vector<1x1024xf32> to vector<8x1024xf32>
    %34 = arith.addf %32, %33 : vector<8x1024xf32>
    %35 = arith.truncf %34 : vector<8x1024xf32> to vector<8x1024xbf16>
    %c0_23 = arith.constant 0 : index
    %c0_24 = arith.constant 0 : index
    %36 = vector.load %arg7[%c0_23, %c0_24] : memref<8x1024xbf16, #tpu.memory_space<vmem>>, vector<8x1024xbf16>
    tpu.vector_store %arg7[%c0_23, %c0_24], %35 {strides = array<i32>} : memref<8x1024xbf16, #tpu.memory_space<vmem>>, vector<8x1024xbf16>,
    return
  }
  func.func @transform_0(%arg0: i32) -> (i32, i32) {
    %c0_i32 = arith.constant 0 : i32
    %c0_i32_0 = arith.constant 0 : i32
    return %arg0, %c0_i32 : i32, i32
  }
  func.func @transform_1(%arg0: i32) -> (i32, i32) {
    %c0_i32 = arith.constant 0 : i32
    %c0_i32_0 = arith.constant 0 : i32
    %c0_i32_1 = arith.constant 0 : i32
    return %c0_i32, %c0_i32_0 : i32, i32
  }
  func.func @transform_2(%arg0: i32) -> (i32, i32) {
    %c0_i32 = arith.constant 0 : i32
    %c0_i32_0 = arith.constant 0 : i32
    %c0_i32_1 = arith.constant 0 : i32
    return %c0_i32, %c0_i32_0 : i32, i32
  }
  func.func @transform_3(%arg0: i32) -> (i32, i32) {
    %c0_i32 = arith.constant 0 : i32
    %c0_i32_0 = arith.constant 0 : i32
    %c0_i32_1 = arith.constant 0 : i32
    return %c0_i32, %c0_i32_0 : i32, i32
  }
  func.func @transform_4(%arg0: i32) -> (i32, i32) {
    %c0_i32 = arith.constant 0 : i32
    %c0_i32_0 = arith.constant 0 : i32
    %c0_i32_1 = arith.constant 0 : i32
    return %c0_i32, %c0_i32_0 : i32, i32
  }
  func.func @transform_5(%arg0: i32) -> (i32, i32) {
    %c0_i32 = arith.constant 0 : i32
    %c0_i32_0 = arith.constant 0 : i32
    %c0_i32_1 = arith.constant 0 : i32
    return %c0_i32, %c0_i32_0 : i32, i32
  }
  func.func @transform_6(%arg0: i32) -> (i32, i32) {
    %c0_i32 = arith.constant 0 : i32
    %c0_i32_0 = arith.constant 0 : i32
    return %arg0, %c0_i32 : i32, i32
  }
  func.func @transform_7(%arg0: i32) -> (i32, i32) {
    %c0_i32 = arith.constant 0 : i32
    %c0_i32_0 = arith.constant 0 : i32
    return %arg0, %c0_i32 : i32, i32
  }
}

</mosaic_0001>

<bundles_post_ra>
// kernel: tpu_custom_call.1
= control target key start
LH: loop header
LB: loop body
LE: loop exit
PB: predicated region body
PF: predicated region fallthrough
CT: control target
= control target key end

     0   :  { %13 = vsyncpa [#allocation3], 0  ;;  %s2000_s0 = inlined_call_operand.vmem [shape: bf16[8,1024], index: 0, kind: input, shape index: {}]   ;;  %s2001_s1 = inlined_call_operand.vmem [shape: bf16[1024,32], index: 1, kind: input, shape index: {}]   ;;  %s2002_s2 = inlined_call_operand.vmem [shape: bf16[32,128], index: 2, kind: input, shape index: {}]   ;;  %s2003_s3 = inlined_call_operand.vmem [shape: bf16[128,32], index: 3, kind: input, shape index: {}]   ;;  %s2004_s4 = inlined_call_operand.vmem [shape: bf16[32,1024], index: 4, kind: input, shape index: {}]   ;;  %s2005_s5 = inlined_call_operand.vmem [shape: f32[1,1408], index: 5, kind: input, shape index: {}]   ;;  %s2006_s6 = inlined_call_operand.hbm [shape: bf16[8,1024], index: 6, kind: output, shape index: {0}]   ;;  %s2007_s7 = inlined_call_operand.hbm [shape: bf16[8,128], index: 7, kind: output, shape index: {1}]  }
   0x1   :  { %v1459_v0 = vld [vmem:[%s2001_s1 + $0x38] sm:$0xff]  ;;  %v1458_v4 = vld [vmem:[%s2001_s1 + $0x30] sm:$0xff]  ;;  %v1457_v8 = vld [vmem:[%s2001_s1 + $0x28] sm:$0xff] }
   0x2   :  { %v1467_v1 = vld [vmem:[%s2001_s1 + $0x78] sm:$0xff]  ;;  %579 = vmatpush.bf16.msra.mxu0 %v1459_v0  ;;  %v1466_v5 = vld [vmem:[%s2001_s1 + $0x70] sm:$0xff]  ;;  %v1465_v9 = vld [vmem:[%s2001_s1 + $0x68] sm:$0xff] }
   0x3   :  { %v1475_v2 = vld [vmem:[%s2001_s1 + $0xb8] sm:$0xff]  ;;  %592 = vmatpush.bf16.msra.mxu1 %v1467_v1  ;;  %v1474_v6 = vld [vmem:[%s2001_s1 + $0xb0] sm:$0xff]  ;;  %v1473_v10 = vld [vmem:[%s2001_s1 + $0xa8] sm:$0xff] }
   0x4   :  { %v1483_v3 = vld [vmem:[%s2001_s1 + $0xf8] sm:$0xff]  ;;  %605 = vmatpush.bf16.msra.mxu2 %v1475_v2  ;;  %v1482_v7 = vld [vmem:[%s2001_s1 + $0xf0] sm:$0xff]  ;;  %v1481_v11 = vld [vmem:[%s2001_s1 + $0xe8] sm:$0xff] }
   0x5   :  { %618 = vmatpush.bf16.msra.mxu3 %v1483_v3  ;;  %v1456_v12 = vld [vmem:[%s2001_s1 + $0x20] sm:$0xff]  ;;  %v1455_v16 = vld [vmem:[%s2001_s1 + $0x18] sm:$0xff]  ;;  %v1454_v20 = vld [vmem:[%s2001_s1 + $0x10] sm:$0xff] }
   0x6   :  { %580 = vmatpush.bf16.msra.mxu0 %v1458_v4  ;;  %v1464_v13 = vld [vmem:[%s2001_s1 + $0x60] sm:$0xff]  ;;  %v1463_v17 = vld [vmem:[%s2001_s1 + $0x58] sm:$0xff]  ;;  %v1462_v21 = vld [vmem:[%s2001_s1 + $0x50] sm:$0xff] }
   0x7   :  { %593 = vmatpush.bf16.msra.mxu1 %v1466_v5  ;;  %v1472_v14 = vld [vmem:[%s2001_s1 + $0xa0] sm:$0xff]  ;;  %v1471_v18 = vld [vmem:[%s2001_s1 + $0x98] sm:$0xff]  ;;  %v1470_v22 = vld [vmem:[%s2001_s1 + $0x90] sm:$0xff] }
   0x8   :  { %606 = vmatpush.bf16.msra.mxu2 %v1474_v6  ;;  %v1480_v15 = vld [vmem:[%s2001_s1 + $0xe0] sm:$0xff]  ;;  %v1479_v19 = vld [vmem:[%s2001_s1 + $0xd8] sm:$0xff]  ;;  %v1478_v23 = vld [vmem:[%s2001_s1 + $0xd0] sm:$0xff] }
   0x9   :  { %619 = vmatpush.bf16.msra.mxu3 %v1482_v7 }
   0xa   :  { %581 = vmatpush.bf16.msra.mxu0 %v1457_v8 }
   0xb   :  { %594 = vmatpush.bf16.msra.mxu1 %v1465_v9 }
   0xc   :  { %607 = vmatpush.bf16.msra.mxu2 %v1473_v10 }
   0xd   :  { %620 = vmatpush.bf16.msra.mxu3 %v1481_v11 }
   0xe   :  { %582 = vmatpush.bf16.msra.mxu0 %v1456_v12 }
   0xf   :  { %595 = vmatpush.bf16.msra.mxu1 %v1464_v13 }
  0x10   :  { %608 = vmatpush.bf16.msra.mxu2 %v1472_v14 }
  0x11   :  { %621 = vmatpush.bf16.msra.mxu3 %v1480_v15 }
  0x12   :  { %583 = vmatpush.bf16.msra.mxu0 %v1455_v16 }
  0x13   :  { %596 = vmatpush.bf16.msra.mxu1 %v1463_v17 }
  0x14   :  { %609 = vmatpush.bf16.msra.mxu2 %v1471_v18 }
  0x15   :  { %622 = vmatpush.bf16.msra.mxu3 %v1479_v19 }
  0x16   :  { %14 = vsyncpa [#allocation5], 0  ;;  %584 = vmatpush.bf16.msra.mxu0 %v1454_v20  ;;  %v1453_v24 = vld [vmem:[%s2001_s1 + $0x8] sm:$0xff]  ;;  %v28_v29 = vld [vmem:[%s2000_s0] sm:$0xff]  ;;  %vm704_vm0 = vcmask 261120   ;;  %s1069_s8 = sshll.u32 %s2007_s7, 4  ;;  %s1070_s8 = int_to_ptr.hbm [resolvable:$true] %s1069_s8 }
  0x17   :  { %597 = vmatpush.bf16.msra.mxu1 %v1462_v21  ;;  %v1461_v25 = vld [vmem:[%s2001_s1 + $0x48] sm:$0xff]  ;;  %v1452_v30 = vld [vmem:[%s2001_s1] sm:$0xff]  ;;  %v171_v33 = vunpack.c.l.b16 %v28_v29  ;;  %v172_v37 = vunpack.c.h.b16 %v28_v29  ;;  %v1491_v38 = vld [vmem:[%s2001_s1 + $0x138] sm:$0xff]  ;;  %s1058_s13 = sshll.u32 %s2006_s6, 4  ;;  %s1059_s13 = int_to_ptr.hbm [resolvable:$true] %s1058_s13 }
  0x18   :  { %v1469_v26 = vld [vmem:[%s2001_s1 + $0x88] sm:$0xff]  ;;  %610 = vmatpush.bf16.msra.mxu2 %v1470_v22  ;;  %v1460_v31 = vld [vmem:[%s2001_s1 + $0x40] sm:$0xff]  ;;  %v1499_v39 = vld [vmem:[%s2001_s1 + $0x178] sm:$0xff] }
  0x19   :  { %623 = vmatpush.bf16.msra.mxu3 %v1478_v23  ;;  %v1477_v27 = vld [vmem:[%s2001_s1 + $0xc8] sm:$0xff]  ;;  %v1468_v34 = vld [vmem:[%s2001_s1 + $0x80] sm:$0xff]  ;;  %v1507_v40 = vld [vmem:[%s2001_s1 + $0x1b8] sm:$0xff]  ;;  %v179_v43 = vpack.c.b16 %v171_v33, %v171_v33  ;;  %v180_v45 = vpack.c.b16 %v172_v37, %v172_v37 }
  0x1a   :  { %v29_v28 = vld [vmem:[%s2000_s0 + $0x8] sm:$0xff]  ;;  %585 = vmatpush.bf16.msra.mxu0 %v1453_v24  ;;  %v1476_v35 = vld [vmem:[%s2001_s1 + $0xc0] sm:$0xff]  ;;  %v1515_v41 = vld [vmem:[%s2001_s1 + $0x1f8] sm:$0xff] }
  0x1b   :  { %598 = vmatpush.bf16.msra.mxu1 %v1461_v25  ;;  %v173_v32 = vunpack.c.l.b16 %v29_v28  ;;  %v174_v36 = vunpack.c.h.b16 %v29_v28  ;;  %v1490_v46 = vld [vmem:[%s2001_s1 + $0x130] sm:$0xff]  ;;  %v1489_v50 = vld [vmem:[%s2001_s1 + $0x128] sm:$0xff]  ;;  %v1488_v54 = vld [vmem:[%s2001_s1 + $0x120] sm:$0xff] }
  0x1c   :  { %611 = vmatpush.bf16.msra.mxu2 %v1469_v26  ;;  %v1498_v47 = vld [vmem:[%s2001_s1 + $0x170] sm:$0xff]  ;;  %v1497_v51 = vld [vmem:[%s2001_s1 + $0x168] sm:$0xff]  ;;  %v1496_v55 = vld [vmem:[%s2001_s1 + $0x160] sm:$0xff] }
  0x1d   :  { %624 = vmatpush.bf16.msra.mxu3 %v1477_v27  ;;  %v181_v42 = vpack.c.b16 %v173_v32, %v173_v32  ;;  %v182_v44 = vpack.c.b16 %v174_v36, %v174_v36  ;;  %v1506_v48 = vld [vmem:[%s2001_s1 + $0x1b0] sm:$0xff]  ;;  %v1505_v52 = vld [vmem:[%s2001_s1 + $0x1a8] sm:$0xff]  ;;  %v1504_v56 = vld [vmem:[%s2001_s1 + $0x1a0] sm:$0xff] }
  0x1e   :  { %586 = vmatpush.bf16.msra.mxu0 %v1452_v30  ;;  %v1514_v49 = vld [vmem:[%s2001_s1 + $0x1f0] sm:$0xff]  ;;  %v1513_v53 = vld [vmem:[%s2001_s1 + $0x1e8] sm:$0xff]  ;;  %v1512_v57 = vld [vmem:[%s2001_s1 + $0x1e0] sm:$0xff] }
  0x1f   :  { %599 = vmatpush.bf16.msra.mxu1 %v1460_v31  ;;  %v1487_v58 = vld [vmem:[%s2001_s1 + $0x118] sm:$0xff]  ;;  %v1486_v62 = vld [vmem:[%s2001_s1 + $0x110] sm:$0xff]  ;;  %v1485_v2 = vld [vmem:[%s2001_s1 + $0x108] sm:$0xff] }
  0x20   :  { %612 = vmatpush.bf16.msra.mxu2 %v1468_v34  ;;  %v1495_v59 = vld [vmem:[%s2001_s1 + $0x158] sm:$0xff]  ;;  %v1494_v63 = vld [vmem:[%s2001_s1 + $0x150] sm:$0xff]  ;;  %v1493_v3 = vld [vmem:[%s2001_s1 + $0x148] sm:$0xff] }
  0x21   :  { %625 = vmatpush.bf16.msra.mxu3 %v1476_v35  ;;  %587 = vmatmul.bf16.vlgmr.msra.gmra.mxu0 %v179_v43  ;;  %v1503_v60 = vld [vmem:[%s2001_s1 + $0x198] sm:$0xff]  ;;  %v1502_v0 = vld [vmem:[%s2001_s1 + $0x190] sm:$0xff]  ;;  %v1501_v5 = vld [vmem:[%s2001_s1 + $0x188] sm:$0xff] }
  0x22   :  { %631 = vmatpush.bf16.msrb.mxu0 %v1491_v38  ;;  %600 = vmatmul.bf16.vlgmr.msra.gmra.mxu1 %v180_v45  ;;  %v1511_v61 = vld [vmem:[%s2001_s1 + $0x1d8] sm:$0xff]  ;;  %v1510_v1 = vld [vmem:[%s2001_s1 + $0x1d0] sm:$0xff]  ;;  %v1509_v6 = vld [vmem:[%s2001_s1 + $0x1c8] sm:$0xff] }
  0x23   :  { %644 = vmatpush.bf16.msrb.mxu1 %v1499_v39  ;;  %613 = vmatmul.bf16.vlgmr.msra.gmra.mxu2 %v181_v42  ;;  %v30_v4 = vld [vmem:[%s2000_s0 + $0x10] sm:$0xff]  ;;  %v31_v7 = vld [vmem:[%s2000_s0 + $0x18] sm:$0xff]  ;;  %v1484_v10 = vld [vmem:[%s2001_s1 + $0x100] sm:$0xff] }
  0x24   :  { %657 = vmatpush.bf16.msrb.mxu2 %v1507_v40  ;;  %626 = vmatmul.bf16.vlgmr.msra.gmra.mxu3 %v182_v44  ;;  %v175_v8 = vunpack.c.l.b16 %v30_v4  ;;  %v176_v9 = vunpack.c.h.b16 %v30_v4  ;;  %v1492_v11 = vld [vmem:[%s2001_s1 + $0x140] sm:$0xff]  ;;  %v177_v12 = vunpack.c.l.b16 %v31_v7  ;;  %v178_v13 = vunpack.c.h.b16 %v31_v7  ;;  %v1517_v20 = vld [vmem:[%s2002_s2 + $0x8] sm:$0xff]  ;;  %v1525_v29 = vld [vmem:[%s2003_s3 + $0x38] sm:$0xff] }
  0x25   :  { %670 = vmatpush.bf16.msrb.mxu3 %v1515_v41  ;;  %v1500_v14 = vld [vmem:[%s2001_s1 + $0x180] sm:$0xff] }
  0x26   :  { %632 = vmatpush.bf16.msrb.mxu0 %v1490_v46  ;;  %v1508_v15 = vld [vmem:[%s2001_s1 + $0x1c0] sm:$0xff]  ;;  %v183_v16 = vpack.c.b16 %v175_v8, %v175_v8  ;;  %v184_v17 = vpack.c.b16 %v176_v9, %v176_v9  ;;  %v185_v18 = vpack.c.b16 %v177_v12, %v177_v12  ;;  %v186_v19 = vpack.c.b16 %v178_v13, %v178_v13 }
  0x27   :  { %645 = vmatpush.bf16.msrb.mxu1 %v1498_v47  ;;  %v1516_v26 = vld [vmem:[%s2002_s2] sm:$0xff] }
  0x28   :  { %658 = vmatpush.bf16.msrb.mxu2 %v1506_v48  ;;  %v1544_v28 = vld [vmem:[%s2005_s5] ss:$0 sm:$0xff] }
  0x29   :  { %671 = vmatpush.bf16.msrb.mxu3 %v1514_v49 }
  0x2a   :  { %633 = vmatpush.bf16.msrb.mxu0 %v1489_v50  ;;  %v1524_v50 = vld [vmem:[%s2003_s3 + $0x30] sm:$0xff] }
  0x2b   :  { %646 = vmatpush.bf16.msrb.mxu1 %v1497_v51  ;;  %v1523_v51 = vld [vmem:[%s2003_s3 + $0x28] sm:$0xff] }
  0x2c   :  { %659 = vmatpush.bf16.msrb.mxu2 %v1505_v52  ;;  %v1522_v52 = vld [vmem:[%s2003_s3 + $0x20] sm:$0xff] }
  0x2d   :  { %672 = vmatpush.bf16.msrb.mxu3 %v1513_v53  ;;  %v1521_v53 = vld [vmem:[%s2003_s3 + $0x18] sm:$0xff] }
  0x2e   :  { %634 = vmatpush.bf16.msrb.mxu0 %v1488_v54  ;;  %v1520_v54 = vld [vmem:[%s2003_s3 + $0x10] sm:$0xff] }
  0x2f   :  { %647 = vmatpush.bf16.msrb.mxu1 %v1496_v55  ;;  %v1519_v55 = vld [vmem:[%s2003_s3 + $0x8] sm:$0xff] }
  0x30   :  { %660 = vmatpush.bf16.msrb.mxu2 %v1504_v56  ;;  %v1518_v56 = vld [vmem:[%s2003_s3] sm:$0xff] }
  0x31   :  { %673 = vmatpush.bf16.msrb.mxu3 %v1512_v57  ;;  %v1545_v57 = vld [vmem:[%s2005_s5 + $0x1] ss:$0 sm:$0xff] }
  0x32   :  { %635 = vmatpush.bf16.msrb.mxu0 %v1487_v58  ;;  %v1414_v58 = vld [vmem:[%s2004_s4 + $0x40] sm:$0xf] }
  0x33   :  { %648 = vmatpush.bf16.msrb.mxu1 %v1495_v59  ;;  %v1538_v59 = vld [vmem:[%s2004_s4 + $0x5c] sm:$0xf0] }
  0x34   :  { %661 = vmatpush.bf16.msrb.mxu2 %v1503_v60  ;;  %v1382_v60 = vld [vmem:[%s2004_s4] sm:$0xf] }
  0x35   :  { %674 = vmatpush.bf16.msrb.mxu3 %v1511_v61  ;;  %v1415_v61 = vor.u32 %v1538_v59, %v1414_v58  ;;  %v1440_v58 = vld [vmem:[%s2004_s4 + $0x78] sm:$0xf0] }
  0x36   :  { %636 = vmatpush.bf16.msrb.mxu0 %v1486_v62  ;;  %v1530_v62 = vld [vmem:[%s2004_s4 + $0x1c] sm:$0xf0] }
  0x37   :  { %649 = vmatpush.bf16.msrb.mxu1 %v1494_v63 }
  0x38   :  { %662 = vmatpush.bf16.msrb.mxu2 %v1502_v0 }
  0x39   :  { %675 = vmatpush.bf16.msrb.mxu3 %v1510_v1  ;;  %v1383_v1 = vor.u32 %v1530_v62, %v1382_v60  ;;  %v1529_v62 = vld [vmem:[%s2004_s4 + $0x1c] sm:$0xf] }
  0x3a   :  { %637 = vmatpush.bf16.msrb.mxu0 %v1485_v2 }
  0x3b   :  { %650 = vmatpush.bf16.msrb.mxu1 %v1493_v3 }
  0x3c   :  { %663 = vmatpush.bf16.msrb.mxu2 %v1501_v5 }
  0x3d   :  { %676 = vmatpush.bf16.msrb.mxu3 %v1509_v6 }
  0x3e   :  { %638 = vmatpush.bf16.msrb.mxu0 %v1484_v10 }
  0x3f   :  { %651 = vmatpush.bf16.msrb.mxu1 %v1492_v11 }
  0x40   :  { %664 = vmatpush.bf16.msrb.mxu2 %v1500_v14 }
  0x41   :  { %677 = vmatpush.bf16.msrb.mxu3 %v1508_v15  ;;  %639 = vmatmul.bf16.vlgmr.msrb.gmra.mxu0 %v183_v16 }
  0x42   :  { %652 = vmatmul.bf16.vlgmr.msrb.gmra.mxu1 %v184_v17  ;;  %714 = vmatpush.bf16.msra.mxu0 %v1517_v20  ;;  %v1422_v20 = vld [vmem:[%s2004_s4 + $0x48] sm:$0xf] }
  0x43   :  { %665 = vmatmul.bf16.vlgmr.msrb.gmra.mxu2 %v185_v18  ;;  %808 = vmatpush.bf16.msra.mxu1 %v1525_v29  ;;  %v1534_v18 = vld [vmem:[%s2004_s4 + $0x44] sm:$0xf]  ;;  %v1390_v29 = vld [vmem:[%s2004_s4 + $0x8] sm:$0xf] }
  0x44   :  { %678 = vmatmul.bf16.vlgmr.msrb.gmra.mxu3 %v186_v19  ;;  %945 = vmatpush.bf16.msra.mxu2 %v1415_v61  ;;  %v1416_v19 = vld [vmem:[%s2004_s4 + $0x60] sm:$0xf0] }
  0x46   :  { %715 = vmatpush.bf16.msra.mxu0 %v1516_v26 }
  0x47   :  { %809 = vmatpush.bf16.msra.mxu1 %v1524_v50  ;;  %v1528_v50 = vld [vmem:[%s2004_s4 + $0x14] sm:$0xf] }
  0x48   :  { %946 = vmatpush.bf16.msra.mxu2 %v1383_v1 }
  0x4b   :  { %810 = vmatpush.bf16.msra.mxu1 %v1523_v51  ;;  %v1400_v51 = vld [vmem:[%s2004_s4 + $0x30] sm:$0xf0] }
  0x4f   :  { %811 = vmatpush.bf16.msra.mxu1 %v1522_v52 }
  0x53   :  { %812 = vmatpush.bf16.msra.mxu1 %v1521_v53  ;;  %v1403_v53 = vor.u32 %v1528_v50, %v1400_v51 }
  0x57   :  { %813 = vmatpush.bf16.msra.mxu1 %v1520_v54  ;;  %v1546_v54 = vld [vmem:[%s2005_s5 + $0x2] ss:$0 sm:$0xff] }
  0x5b   :  { %814 = vmatpush.bf16.msra.mxu1 %v1519_v55 }
  0x5f   :  { %815 = vmatpush.bf16.msra.mxu1 %v1518_v56 }
  0x9e   :  { %v588_v21 = vpop.f32.mrf.mxu0 }
  0x9f   :  { %v601_v22 = vpop.f32.mrf.mxu1  ;;  %v589_v32 = vadd.f32 %v1544_v28, %v588_v21  ;;  %v1419_v21 = vor.u32 %v1534_v18, %v1416_v19  ;;  %v1384_v28 = vld [vmem:[%s2004_s4 + $0x20] sm:$0xf0] }
  0xa1   :  { %v602_v33 = vadd.f32 %v601_v22, %v589_v32  ;;  %v1539_v22 = vld [vmem:[%s2004_s4 + $0x64] sm:$0xf0]  ;;  %958 = vmatpush.bf16.msra.mxu3 %v1419_v21  ;;  %v1406_v32 = vld [vmem:[%s2004_s4 + $0x18] sm:$0xf] }
  0xa6   :  { %v614_v23 = vpop.f32.mrf.mxu2  ;;  %v590_v25 = vpop.f32.mrf.mxu0 }
  0xa7   :  { %v627_v24 = vpop.f32.mrf.mxu3  ;;  %v603_v27 = vpop.f32.mrf.mxu1  ;;  %v615_v34 = vadd.f32 %v614_v23, %v602_v33  ;;  %v1438_v23 = vld [vmem:[%s2004_s4 + $0x58] sm:$0xf]  ;;  %v1423_v25 = vor.u32 %v1539_v22, %v1422_v20 }
  0xa8   :  { %v1526_v27 = vld [vmem:[%s2004_s4 + $0x4] sm:$0xf]  ;;  %v1533_v33 = vld [vmem:[%s2004_s4 + $0x34] sm:$0xf0] }
  0xa9   :  { %v628_v35 = vadd.f32 %v627_v24, %v615_v34  ;;  %v1541_v24 = vld [vmem:[%s2004_s4 + $0x74] sm:$0xf0]  ;;  %971 = vmatpush.bf16.msrb.mxu0 %v1423_v25 }
  0xaa   :  { %v1439_v26 = vor.u32 %v1541_v24, %v1438_v23 }
  0xac   :  { %1023 = vmatpush.bf16.msrb.mxu1 %v1439_v26 }
  0xae   :  { %v616_v30 = vpop.f32.mrf.mxu2 }
  0xaf   :  { %v629_v31 = vpop.f32.mrf.mxu3  ;;  %v1387_v30 = vor.u32 %v1526_v27, %v1384_v28 }
  0xb0   :  { %v1531_v31 = vld [vmem:[%s2004_s4 + $0x24] sm:$0xf0] }
  0xb1   :  { %v1391_v34 = vor.u32 %v1531_v31, %v1390_v29  ;;  %959 = vmatpush.bf16.msra.mxu3 %v1387_v30 }
  0xb3   :  { %972 = vmatpush.bf16.msrb.mxu0 %v1391_v34 }
  0xbe   :  { %v640_v36 = vpop.f32.mrf.mxu0 }
  0xbf   :  { %v653_v37 = vpop.f32.mrf.mxu1  ;;  %v641_v38 = vadd.f32 %v640_v36, %v628_v35  ;;  %v1407_v35 = vor.u32 %v1533_v33, %v1406_v32  ;;  %v1535_v36 = vld [vmem:[%s2004_s4 + $0x4c] sm:$0xf] }
  0xc1   :  { %v654_v39 = vadd.f32 %v653_v37, %v641_v38  ;;  %1024 = vmatpush.bf16.msrb.mxu1 %v1407_v35  ;;  %v1424_v37 = vld [vmem:[%s2004_s4 + $0x68] sm:$0xf0] }
  0xc2   :  { %v1527_v38 = vld [vmem:[%s2004_s4 + $0xc] sm:$0xf] }
  0xc6   :  { %v666_v40 = vpop.f32.mrf.mxu2  ;;  %v642_v43 = vpop.f32.mrf.mxu0 }
  0xc7   :  { %v679_v41 = vpop.f32.mrf.mxu3  ;;  %v667_v42 = vadd.f32 %v666_v40, %v654_v39  ;;  %v655_v44 = vpop.f32.mrf.mxu1  ;;  %v1427_v39 = vor.u32 %v1535_v36, %v1424_v37  ;;  %v1392_v40 = vld [vmem:[%s2004_s4 + $0x28] sm:$0xf0] }
  0xc8   :  { %v1536_v44 = vld [vmem:[%s2004_s4 + $0x54] sm:$0xf] }
  0xc9   :  { %v680_v45 = vadd.f32 %v679_v41, %v667_v42  ;;  %v1430_v41 = vld [vmem:[%s2004_s4 + $0x50] sm:$0xf]  ;;  %984 = vmatpush.bf16.msrb.mxu2 %v1427_v39 }
  0xca   :  { %v1540_v42 = vld [vmem:[%s2004_s4 + $0x6c] sm:$0xf0] }
  0xcb   :  { %v683_v46 = vmax.f32 %v680_v45, 0.0  ;;  %v1431_v43 = vor.u32 %v1540_v42, %v1430_v41  ;;  %v1432_v45 = vld [vmem:[%s2004_s4 + $0x70] sm:$0xf0] }
  0xcd   :  { %v684_v47 = vpack.c.bf16 %v683_v46, %v683_v46  ;;  %v1398_v46 = vld [vmem:[%s2004_s4 + $0x10] sm:$0xf]  ;;  %997 = vmatpush.bf16.msrb.mxu3 %v1431_v43 }
  0xce   :  { %v668_v48 = vpop.f32.mrf.mxu2 }
  0xcf   :  { %v681_v49 = vpop.f32.mrf.mxu3  ;;  %1347 = vmatmul.msk.bf16.vlgmr.msra.gmra.mxu0 %vm704_vm0, %v684_v47  ;;  %v1395_v47 = vor.u32 %v1527_v38, %v1392_v40  ;;  %v1435_v48 = vor.u32 %v1536_v44, %v1432_v45 }
  0xd0   :  { %v1532_v49 = vld [vmem:[%s2004_s4 + $0x2c] sm:$0xf0] }
  0xd1   :  { %v1399_v52 = vor.u32 %v1532_v49, %v1398_v46  ;;  %1010 = vmatpush.bf16.msra.mxu0 %v1435_v48  ;;  %985 = vmatpush.bf16.msrb.mxu2 %v1395_v47 }
  0xd3   :  { %998 = vmatpush.bf16.msrb.mxu3 %v1399_v52 }
  0xd5   :  { %1011 = vmatpush.bf16.msra.mxu0 %v1403_v53 }
 0x14c   :  { %v717_v63 = vpop.f32.mrf.mxu0 }
 0x14d   :  { %v718_v0 = vadd.f32 %v1545_v57, %v717_v63  ;;  %v1537_v57 = vld [vmem:[%s2004_s4 + $0x5c] sm:$0xf] }
 0x14e   :  { %v1443_v61 = vor.u32 %v1537_v57, %v1440_v58  ;;  %v1408_v63 = vld [vmem:[%s2004_s4 + $0x38] sm:$0xf0]  ;;  %s1601_s4 = smov [#allocation4]  }
 0x14f   :  { %v721_v2 = vand.u32 2147483647, %v718_v0  ;;  %v1411_v1 = vor.u32 %v1529_v62, %v1408_v63  ;;  %s1067_s28 = sshll.u32 %s1601_s4, 4  ;;  %s1068_s28 = int_to_ptr.vmem [resolvable:$true] %s1067_s28 }
 0x151   :  { %v722_v3 = vmul.f32 0.33333334, %v721_v2 }
 0x153   :  { %v723_v4 = vadd.f32 1.0, %v722_v3 }
 0x154   :  { %v719_v5 = vpop.f32.mrf.mxu0 }
 0x155   :  { %1547 = vrcp.f32 %v723_v4  ;;  %v735_v9 = vand.u32 2147483648, %v723_v4  ;;  %v733_v11 = vand.u32 2147483647, %v723_v4  ;;  %vm729_vm2 = vweird.f32 %v723_v4 }
 0x157   :  { %v736_v13 = vor.u32 1.1754944e-38, %v735_v9  ;;  %vm734_vm4 = vcmp.eq.f32.partialorder %v733_v11, 8.507059e+37 }
 0x15b   :  { %v1548_v6 = vpop.eup %1547 }
 0x15c   :  { %v725_v7 = vmul.f32 %v1548_v6, %v723_v4  ;;  %vm730_vm1 = vweird.f32 %v1548_v6  ;;  %v35_v4 = vld [vmem:[%s2005_s5 + $0x3] sm:$0xff]  ;;  %s1602_s5 = smov [#allocation2]  }
 0x15d   :  { %vm731_vm3 = vmor %vm729_vm2, %vm730_vm1  ;;  %v840_v5 = vperm.slane %v35_v4, 0  ;;  %v845_v18 = vperm.slane %v35_v4, 5  ;;  %v843_v19 = vperm.slane %v35_v4, 3  ;;  %v844_v20 = vperm.slane %v35_v4, 4  ;;  %s1056_s7 = sshll.u32 %s1602_s5, 4  ;;  %s1057_s7 = int_to_ptr.vmem [resolvable:$true] %s1056_s7 }
 0x15e   :  { %v726_v8 = vsub.f32 1.0, %v725_v7  ;;  %v846_v32 = vperm.slane %v35_v4, 6  ;;  %v847_v33 = vperm.slane %v35_v4, 7 }
 0x160   :  { %v727_v10 = vmul.f32 %v1548_v6, %v726_v8 }
 0x162   :  { %v728_v12 = vadd.f32 %v1548_v6, %v727_v10 }
 0x164   :  { %v732_v14 = vsel %vm731_vm3, %v1548_v6, %v728_v12  ;;  %v841_v6 = vperm.slane %v35_v4, 1 }
 0x165   :  { %v737_v15 = vsel %vm734_vm4, %v736_v13, %v732_v14 }
 0x166   :  { %v738_v16 = vmul.f32 %v737_v15, %v718_v0 }
 0x168   :  { %v739_v17 = vpack.c.bf16 %v738_v16, %v738_v16 }
 0x16a   :  { %740 = vst [vmem:[#allocation4] sm:$0xf] %v739_v17  ;;  %816 = vmatmul.bf16.vlgmr.msra.gmra.mxu1 %v739_v17  ;;  %v842_v17 = vperm.slane %v35_v4, 2 }
 0x16b   :  { %1072 = dma.vmem_to_hbm [thread:$0]  %s1068_s28, 64, %s1070_s8, [#allocation5]  }
 0x1e7   :  { %v817_v55 = vpop.f32.mrf.mxu1 }
 0x1e8   :  { %v818_v56 = vadd.f32 %v1546_v54, %v817_v55 }
 0x1ea   :  { %v821_v59 = vmax.f32 %v818_v56, 0.0 }
 0x1ec   :  { %v822_v60 = vpack.c.bf16 %v821_v59, %v821_v59 }
 0x1ee   :  { %1444 = vmatmul.msk.bf16.vlgmr.msra.gmra.mxu2 %vm704_vm0, %v822_v60  ;;  %1445 = vmatmul.msk.bf16.vlgmr.msra.gmra.mxu3 %vm704_vm0, %v822_v60 }
 0x1ef   :  { %1446 = vmatmul.msk.bf16.vlgmr.msrb.gmra.mxu0 %vm704_vm0, %v822_v60  ;;  %1450 = vmatmul.msk.bf16.vlgmr.msrb.gmra.mxu1 %vm704_vm0, %v822_v60  ;;  %v819_v0 = vpop.f32.mrf.mxu1 }
 0x1f0   :  { %1036 = vmatpush.bf16.msra.mxu2 %v1443_v61 }
 0x1f4   :  { %1037 = vmatpush.bf16.msra.mxu2 %v1411_v1 }
 0x1fe   :  { %1447 = vmatmul.msk.bf16.vlgmr.msrb.gmra.mxu2 %vm704_vm0, %v822_v60  ;;  %1448 = vmatmul.msk.bf16.vlgmr.msrb.gmra.mxu3 %vm704_vm0, %v822_v60 }
 0x1ff   :  { %1449 = vmatmul.msk.bf16.vlgmr.msra.gmra.mxu0 %vm704_vm0, %v822_v60 }
 0x20e   :  { %1451 = vmatmul.msk.bf16.vlgmr.msra.gmra.mxu2 %vm704_vm0, %v822_v60 }
 0x26c   :  { %v974_v2 = vpop.f32.mrf.mxu0  ;;  %v1026_v3 = vpop.f32.mrf.mxu1 }
 0x26d   :  { %v975_v23 = vadd.f32 %v974_v2, %v842_v17  ;;  %v1027_v35 = vadd.f32 %v1026_v3, %v846_v32 }
 0x271   :  { %v948_v7 = vpop.f32.mrf.mxu2  ;;  %v961_v8 = vpop.f32.mrf.mxu3 }
 0x272   :  { %v949_v9 = vadd.f32 %v948_v7, %v840_v5  ;;  %v962_v10 = vadd.f32 %v961_v8, %v841_v6 }
 0x274   :  { %v1043_v11 = vpack.c.bf16 %v962_v10, %v949_v9  ;;  %v976_v12 = vpop.f32.mrf.mxu0  ;;  %v1028_v13 = vpop.f32.mrf.mxu1 }
 0x276   :  { %1047 = vst [vmem:[#allocation2] sm:$0xff] %v1043_v11 }
 0x279   :  { %v950_v14 = vpop.f32.mrf.mxu2  ;;  %v963_v15 = vpop.f32.mrf.mxu3 }
 0x27c   :  { %v1013_v16 = vpop.f32.mrf.mxu0 }
 0x27d   :  { %v1014_v24 = vadd.f32 %v1013_v16, %v845_v18 }
 0x281   :  { %v987_v21 = vpop.f32.mrf.mxu2  ;;  %v1000_v22 = vpop.f32.mrf.mxu3 }
 0x282   :  { %v988_v25 = vadd.f32 %v987_v21, %v843_v19  ;;  %v1001_v26 = vadd.f32 %v1000_v22, %v844_v20 }
 0x284   :  { %v1044_v27 = vpack.c.bf16 %v988_v25, %v975_v23  ;;  %v1045_v28 = vpack.c.bf16 %v1014_v24, %v1001_v26  ;;  %v1015_v29 = vpop.f32.mrf.mxu0 }
 0x286   :  { %1048 = vst [vmem:[#allocation2 + $0x8] sm:$0xff] %v1044_v27 }
 0x287   :  { %1049 = vst [vmem:[#allocation2 + $0x10] sm:$0xff] %v1045_v28 }
 0x289   :  { %v989_v30 = vpop.f32.mrf.mxu2  ;;  %v1002_v31 = vpop.f32.mrf.mxu3 }
 0x291   :  { %v1039_v34 = vpop.f32.mrf.mxu2 }
 0x292   :  { %v1040_v36 = vadd.f32 %v1039_v34, %v847_v33 }
 0x294   :  { %v1046_v37 = vpack.c.bf16 %v1040_v36, %v1027_v35 }
 0x296   :  { %1050 = vst [vmem:[#allocation2 + $0x18] sm:$0xff] %v1046_v37 }
 0x297   :  { %1061 = dma.vmem_to_hbm [thread:$0]  %s1057_s7, 512, %s1059_s13, [#allocation3]  }
 0x299   :  { %v1041_v38 = vpop.f32.mrf.mxu2 }
 0x29a   :  { %1597 = dma.done.wait [#allocation3], 512  }
 0x29b   :  { %1598 = vsyncadd [#allocation3], 4294966784 }
 0x29c   :  { %1599 = dma.done.wait [#allocation5], 64  }
 0x29d   :  { %1600 = vsyncadd [#allocation5], 4294967232 }
 0x29e   :  { %1081 = vsyncpa [#allocation3], 1 }
 0x29f   :  { %1082 = vsyncpa [#allocation5], 1 }

</bundles_post_ra>
